<compile_context>
chip_gen: v7x
topology: tpu7x:2x2x1
jax: 0.10.0
libtpu: 0.0.40
codegen_flags: <defaults>
</compile_context>

<pallas_src>
import functools

import jax
import jax.numpy as jnp
from jax import lax
from jax.experimental import pallas as pl
from jax.experimental.pallas import tpu as pltpu


def _round_up(x, m):
    return (x + m - 1) // m * m


def _round_down(x, m):
    return (x // m) * m


def _sublane_multiple(dtype):
    itemsize = jnp.dtype(dtype).itemsize
    return 8 * max(1, 4 // max(1, itemsize))   # 8 (f32) / 16 (bf16) / 32 (i8)


def _vmem_capacity_bytes():
    """Trace-time VMEM capacity query; conservative (v7x) fallback."""
    try:
        info = pltpu.get_tpu_info()
        for attr in ("vmem_capacity_bytes", "vmem_bytes", "vmem_size_bytes"):
            cap = getattr(info, attr, None)
            if cap:
                return int(cap)
    except Exception:
        pass
    return 64 << 20


# ---------------------------------------------------------------------------
# Kernels
# ---------------------------------------------------------------------------

def _pw_single_kernel(y_ref, b1_ref, b2_ref, th_ref, o_ref):
    # y_ref: (TB, D) in Y dtype; params: (1, D) float32; o_ref: (TB, 1).
    y = y_ref[...].astype(jnp.float32)
    b1 = b1_ref[...]
    b2 = b2_ref[...]
    th = th_ref[...]
    util = jnp.where(y < th, y * b1 + (b2 - b1) * th, y * b2)
    # TODO(synk): if a v7x bundle dump shows the VALU slot binding, offload
    # this row-sum to the MXU (jnp.dot against a ones column) instead.
    o_ref[...] = jnp.sum(util, axis=-1, keepdims=True).astype(o_ref.dtype)


def _pw_split_kernel(y_ref, b1_ref, b2_ref, th_ref, o_ref, acc_ref, *, D, tile_d):
    # y_ref: (TB, tile_d); params resident (1, d_pad) f32; o_ref: (TB, 1);
    # acc_ref: (TB, 1) f32, resident across the k (reduction) grid axis.
    k = pl.program_id(1)

    @pl.when(k == 0)
    def _init():
        acc_ref[...] = jnp.zeros_like(acc_ref)

    start = pl.multiple_of(k * tile_d, 128)
    y = y_ref[...].astype(jnp.float32)
    b1 = b1_ref[:, pl.ds(start, tile_d)]
    b2 = b2_ref[:, pl.ds(start, tile_d)]
    th = th_ref[:, pl.ds(start, tile_d)]

    util = jnp.where(y < th, y * b1 + (b2 - b1) * th, y * b2)

    # Y is NOT padded in HBM: the last D-tile's out-of-range lanes hold
    # garbage (possibly NaN), so they must be masked before the reduction.
    if D % tile_d != 0:
        col = k * tile_d + lax.broadcasted_iota(jnp.int32, util.shape, 1)
        util = jnp.where(col < D, util, 0.0)

    acc_ref[...] += jnp.sum(util, axis=-1, keepdims=True)

    @pl.when(k == pl.num_programs(1) - 1)
    def _finalize():
        o_ref[...] = acc_ref[...].astype(o_ref.dtype)


# ---------------------------------------------------------------------------
# Wrapper
# ---------------------------------------------------------------------------

def piecewise_linear_forward(Y, beta1, beta2, thresholds, *,
                             bytes_per_step=None,
                             max_single_d=None,
                             tile_d_when_split=2048):
    """Y: (B, D). beta1/beta2/thresholds: (D,). Returns (B, 1) in Y.dtype."""
    B, D = Y.shape
    dtype = Y.dtype
    itemsize = jnp.dtype(dtype).itemsize
    sublane = _sublane_multiple(dtype)

    # Params stay float32 (tiny arrays; avoids perturbing thresholds for bf16 Y).
    b1 = beta1.reshape(1, D).astype(jnp.float32)
    b2 = beta2.reshape(1, D).astype(jnp.float32)
    th = thresholds.reshape(1, D).astype(jnp.float32)

    # Generation-aware VMEM budgets.
    vmem_cap = _vmem_capacity_bytes()
    if vmem_cap >= (96 << 20):          # v5e / v6e: 128 MiB per TensorCore
        y_budget = 80 << 20
        vmem_cap_limit = 100 << 20
    else:                               # v7x: 64 MiB per TensorCore
        y_budget = 24 << 20
        vmem_cap_limit = 48 << 20

    if bytes_per_step is None:
        bytes_per_step = min(16 << 20, y_budget // 2)   # double-buffered fit
    bytes_per_step = max(bytes_per_step, sublane * itemsize)

    if max_single_d is None:
        # Stay single-block as long as one sublane-group of rows fits a step.
        max_single_d = bytes_per_step // (sublane * itemsize)

    # -------- single-D-block path: no reduction axis, no accumulator --------
    if D <= max_single_d:
        row_bytes = D * itemsize
        tile_b = max(sublane, _round_down(bytes_per_step // row_bytes, sublane))
        if tile_b >= B:
            tile_b = B
        grid = (pl.cdiv(B, tile_b),)

        need = (2 * tile_b * D * itemsize        # Y, double-buffered
                + 2 * 3 * D * 4                  # f32 params
                + 2 * tile_b * itemsize)         # output blocks
        vmem_limit = int(min(max(need + (8 << 20), 32 << 20), vmem_cap_limit))

        return pl.pallas_call(
            _pw_single_kernel,
            out_shape=jax.ShapeDtypeStruct((B, 1), dtype),
            grid_spec=pltpu.PrefetchScalarGridSpec(
                num_scalar_prefetch=0,
                grid=grid,
                in_specs=[
                    pl.BlockSpec((tile_b, D), lambda i: (i, 0)),   # Y tile
                    pl.BlockSpec((1, D), lambda i: (0, 0)),        # beta1
                    pl.BlockSpec((1, D), lambda i: (0, 0)),        # beta2
                    pl.BlockSpec((1, D), lambda i: (0, 0)),        # thresholds
                ],
                out_specs=pl.BlockSpec((tile_b, 1), lambda i: (i, 0)),
            ),
            compiler_params=pltpu.CompilerParams(
                dimension_semantics=("parallel",),
                vmem_limit_bytes=vmem_limit,
            ),
        )(Y, b1, b2, th)

    # -------- split-D path: tiled reduction, tail masked in-kernel --------
    tile_d = min(int(tile_d_when_split), _round_up(D, 128))
    tile_d = max(128, _round_down(tile_d, 128))
    d_pad = _round_up(D, tile_d)

    # Cheap pad on the tiny (1, D) params only; Y itself is never padded.
    if d_pad != D:
        pad = ((0, 0), (0, d_pad - D))
        b1 = jnp.pad(b1, pad)
        b2 = jnp.pad(b2, pad)
        th = jnp.pad(th, pad)

    tile_b = max(sublane,
                 _round_down(bytes_per_step // (tile_d * itemsize), sublane))
    if tile_b >= B:
        tile_b = B
    grid = (pl.cdiv(B, tile_b), pl.cdiv(D, tile_d))

    need = (2 * tile_b * tile_d * itemsize       # Y, double-buffered
            + 2 * 3 * d_pad * 4                  # resident f32 params (+slack)
            + 2 * tile_b * itemsize              # output blocks
            + tile_b * 4)                        # f32 accumulator
    vmem_limit = int(min(max(need + (8 << 20), 32 << 20), vmem_cap_limit))

    kernel = functools.partial(_pw_split_kernel, D=D, tile_d=tile_d)

    return pl.pallas_call(
        kernel,
        out_shape=jax.ShapeDtypeStruct((B, 1), dtype),
        grid_spec=pltpu.PrefetchScalarGridSpec(
            num_scalar_prefetch=0,
            grid=grid,
            in_specs=[
                pl.BlockSpec((tile_b, tile_d), lambda i, k: (i, k)),  # Y tile
                pl.BlockSpec((1, d_pad), lambda i, k: (0, 0)),        # beta1 (resident)
                pl.BlockSpec((1, d_pad), lambda i, k: (0, 0)),        # beta2 (resident)
                pl.BlockSpec((1, d_pad), lambda i, k: (0, 0)),        # thresholds (resident)
            ],
            out_specs=pl.BlockSpec((tile_b, 1), lambda i, k: (i, 0)),
            scratch_shapes=[pltpu.VMEM((tile_b, 1), jnp.float32)],
        ),
        compiler_params=pltpu.CompilerParams(
            dimension_semantics=("parallel", "arbitrary"),
            vmem_limit_bytes=vmem_limit,
        ),
    )(Y, b1, b2, th)


def piecewise_linear_reference(Y, beta1, beta2, thresholds):
    """Pure-JAX reference mirroring the torch module (f32 math, cast at end)."""
    y = Y.astype(jnp.float32)
    b1 = beta1.astype(jnp.float32)[None, :]
    b2 = beta2.astype(jnp.float32)[None, :]
    th = thresholds.astype(jnp.float32)[None, :]
    util = jnp.where(y < th, y * b1 + (b2 - b1) * th, y * b2)
    return jnp.sum(util, axis=-1)[:, None].astype(Y.dtype)


if __name__ == "__main__":
    key = jax.random.PRNGKey(0)
    keys = jax.random.split(key, 10)

    # --- primary small case (matches module scale: batch=16, outcome_dim=32) ---
    B, D = 16, 32
    beta1 = 2.0 + jax.random.uniform(keys[0], (D,), dtype=jnp.float32)
    beta2 = 0.1 + 0.4 * jax.random.uniform(keys[1], (D,), dtype=jnp.float32)
    thresholds = jax.random.normal(keys[2], (D,), dtype=jnp.float32)
    Y = jax.random.normal(keys[3], (B, D), dtype=jnp.float32)

    out = jax.block_until_ready(piecewise_linear_forward(Y, beta1, beta2, thresholds))
    ref = piecewise_linear_reference(Y, beta1, beta2, thresholds)
    assert out.shape == (B, 1), out.shape
    assert jnp.allclose(out, ref, atol=1e-5, rtol=1e-5), ("mismatch", out, ref)

    # --- partial last batch block (B not a multiple of tile_b) ---
    Yp = jax.random.normal(keys[4], (20, D), dtype=jnp.float32)
    out_p = jax.block_until_ready(
        piecewise_linear_forward(Yp, beta1, beta2, thresholds,
                                 bytes_per_step=8 * D * 4))   # forces tile_b=8
    ref_p = piecewise_linear_reference(Yp, beta1, beta2, thresholds)
    assert out_p.shape == (20, 1)
    assert jnp.allclose(out_p, ref_p, atol=1e-5, rtol=1e-5), "mismatch partial-B"

    # --- split-D reduction path: un-padded Y, in-kernel tail mask, acc, partial B ---
    B2, D2 = 20, 300
    kk = jax.random.split(jax.random.PRNGKey(1), 4)
    b1_s = 2.0 + jax.random.uniform(kk[0], (D2,), dtype=jnp.float32)
    b2_s = 0.1 + 0.4 * jax.random.uniform(kk[1], (D2,), dtype=jnp.float32)
    th_s = jax.random.normal(kk[2], (D2,), dtype=jnp.float32)
    Y_s = jax.random.normal(kk[3], (B2, D2), dtype=jnp.float32)
    out_s = jax.block_until_ready(
        piecewise_linear_forward(Y_s, b1_s, b2_s, th_s,
                                 max_single_d=128,           # force split path
                                 tile_d_when_split=128,
                                 bytes_per_step=16 * 128 * 4))  # tile_b=16 < 20
    ref_s = piecewise_linear_reference(Y_s, b1_s, b2_s, th_s)
    assert out_s.shape == (B2, 1)
    assert jnp.allclose(out_s, ref_s, atol=1e-4, rtol=1e-5), "mismatch split-D"

    # --- bf16 Y with float32 params (params must not be rounded to bf16) ---
    Y_bf = jax.random.normal(keys[5], (B, D), dtype=jnp.float32).astype(jnp.bfloat16)
    out_bf = jax.block_until_ready(
        piecewise_linear_forward(Y_bf, beta1, beta2, thresholds))
    ref_bf = piecewise_linear_reference(Y_bf, beta1, beta2, thresholds)
    assert out_bf.shape == (B, 1) and out_bf.dtype == jnp.bfloat16
    assert jnp.allclose(out_bf.astype(jnp.float32), ref_bf.astype(jnp.float32),
                        atol=1e-2, rtol=1e-2), "mismatch bf16"

    print("KERNEL_OK")
</pallas_src>

<mosaic_0001>
module attributes {stable_mosaic.version = 11 : i64} {
  func.func @_pw_single_kernel(%arg0: i32, %arg1: memref<16x32xf32, #tpu.memory_space<vmem>>, %arg2: memref<1x32xf32, #tpu.memory_space<vmem>>, %arg3: memref<1x32xf32, #tpu.memory_space<vmem>>, %arg4: memref<1x32xf32, #tpu.memory_space<vmem>>, %arg5: memref<16x1xf32, #tpu.memory_space<vmem>>) attributes {dimension_semantics = [#tpu.dimension_semantics<parallel>], iteration_bounds = array<i64: 1>, scalar_prefetch = 0 : i64, scratch_operands = 0 : i64, tpu.core_type = #tpu.core_type<tc>, window_params = [{transform_indices = @transform_0, window_bounds = array<i64: 16, 32>}, {pipeline_mode = #tpu.pipeline_mode<synchronous>, transform_indices = @transform_1, window_bounds = array<i64: 1, 32>}, {pipeline_mode = #tpu.pipeline_mode<synchronous>, transform_indices = @transform_2, window_bounds = array<i64: 1, 32>}, {pipeline_mode = #tpu.pipeline_mode<synchronous>, transform_indices = @transform_3, window_bounds = array<i64: 1, 32>}, {transform_indices = @transform_4, window_bounds = array<i64: 16, 1>}]} {
    %c0 = arith.constant 0 : index
    %c0_0 = arith.constant 0 : index
    %0 = vector.load %arg1[%c0, %c0_0] : memref<16x32xf32, #tpu.memory_space<vmem>>, vector<16x32xf32>
    %c0_1 = arith.constant 0 : index
    %c0_2 = arith.constant 0 : index
    %1 = vector.load %arg2[%c0_1, %c0_2] : memref<1x32xf32, #tpu.memory_space<vmem>>, vector<1x32xf32>
    %c0_3 = arith.constant 0 : index
    %c0_4 = arith.constant 0 : index
    %2 = vector.load %arg3[%c0_3, %c0_4] : memref<1x32xf32, #tpu.memory_space<vmem>>, vector<1x32xf32>
    %c0_5 = arith.constant 0 : index
    %c0_6 = arith.constant 0 : index
    %3 = vector.load %arg4[%c0_5, %c0_6] : memref<1x32xf32, #tpu.memory_space<vmem>>, vector<1x32xf32>
    %4 = vector.broadcast %3 : vector<1x32xf32> to vector<16x32xf32>
    %5 = arith.cmpf olt, %0, %4 : vector<16x32xf32>
    %6 = vector.broadcast %1 : vector<1x32xf32> to vector<16x32xf32>
    %7 = arith.mulf %0, %6 : vector<16x32xf32>
    %8 = arith.subf %2, %1 : vector<1x32xf32>
    %9 = arith.mulf %8, %3 : vector<1x32xf32>
    %10 = vector.broadcast %9 : vector<1x32xf32> to vector<16x32xf32>
    %11 = arith.addf %7, %10 : vector<16x32xf32>
    %12 = vector.broadcast %2 : vector<1x32xf32> to vector<16x32xf32>
    %13 = arith.mulf %0, %12 : vector<16x32xf32>
    %14 = arith.select %5, %11, %13 : vector<16x32xi1>, vector<16x32xf32>
    %cst = arith.constant dense<0.000000e+00> : vector<16xf32>
    %15 = vector.multi_reduction <add>, %14, %cst [1] : vector<16x32xf32> to vector<16xf32>
    %16 = vector.shape_cast %15 : vector<16xf32> to vector<16x1xf32>
    %c0_7 = arith.constant 0 : index
    %c0_8 = arith.constant 0 : index
    %17 = vector.load %arg5[%c0_7, %c0_8] : memref<16x1xf32, #tpu.memory_space<vmem>>, vector<16x1xf32>
    tpu.vector_store %arg5[%c0_7, %c0_8], %16 {strides = array<i32>} : memref<16x1xf32, #tpu.memory_space<vmem>>, vector<16x1xf32>,
    return
  }
  func.func @transform_0(%arg0: i32) -> (i32, i32) {
    %c0_i32 = arith.constant 0 : i32
    %c0_i32_0 = arith.constant 0 : i32
    return %arg0, %c0_i32 : i32, i32
  }
  func.func @transform_1(%arg0: i32) -> (i32, i32) {
    %c0_i32 = arith.constant 0 : i32
    %c0_i32_0 = arith.constant 0 : i32
    %c0_i32_1 = arith.constant 0 : i32
    return %c0_i32, %c0_i32_0 : i32, i32
  }
  func.func @transform_2(%arg0: i32) -> (i32, i32) {
    %c0_i32 = arith.constant 0 : i32
    %c0_i32_0 = arith.constant 0 : i32
    %c0_i32_1 = arith.constant 0 : i32
    return %c0_i32, %c0_i32_0 : i32, i32
  }
  func.func @transform_3(%arg0: i32) -> (i32, i32) {
    %c0_i32 = arith.constant 0 : i32
    %c0_i32_0 = arith.constant 0 : i32
    %c0_i32_1 = arith.constant 0 : i32
    return %c0_i32, %c0_i32_0 : i32, i32
  }
  func.func @transform_4(%arg0: i32) -> (i32, i32) {
    %c0_i32 = arith.constant 0 : i32
    %c0_i32_0 = arith.constant 0 : i32
    return %arg0, %c0_i32 : i32, i32
  }
}

</mosaic_0001>

<bundles_post_ra>
// kernel: tpu_custom_call.1
= control target key start
LH: loop header
LB: loop body
LE: loop exit
PB: predicated region body
PF: predicated region fallthrough
CT: control target
= control target key end

     0   :  { %9 = vsyncpa [#allocation3], 0  ;;  %s114_s15 = smov [#allocation2]   ;;  %s169_s0 = inlined_call_operand.hbm [shape: f32[16,32], index: 0, kind: input, shape index: {}]   ;;  %s170_s1 = inlined_call_operand.vmem [shape: f32[1,32], index: 1, kind: input, shape index: {}]   ;;  %s171_s2 = inlined_call_operand.vmem [shape: f32[1,32], index: 2, kind: input, shape index: {}]   ;;  %s172_s3 = inlined_call_operand.vmem [shape: f32[1,32], index: 3, kind: input, shape index: {}]   ;;  %s173_s4 = inlined_call_operand.vmem [shape: f32[16,1], index: 4, kind: output, shape index: {}]  }
   0x1   :  { %s15_s16 = sshll.u32 %s114_s15, 4  ;;  %s90_s19 = scalar_lea.hbm %s169_s0, 256  ;;  %s16_s16 = int_to_ptr.vmem [resolvable:$true] %s15_s16 }
   0x2   :  { %p91_p0 = scmp.ne.s32.totalorder %s169_s0, %s90_s19  ;;  %p94_p1 = scmp.lt.u32.totalorder %s90_s19, %s169_s0 }
   0x4   :  { %p96_p2 = pnand %p94_p1, %p91_p0 }
   0x6   :  { %99 = shalt.err (!%p96_p2)
}
   0x7   :  { %s100_s24 = scalar_lea.vmem %s16_s16, 256  ;;  %p105_p4 = scmp.lt.s32.totalorder %s16_s16, %s16_s16 }
   0x8   :  { %p101_p3 = scmp.ne.s32.totalorder %s16_s16, %s100_s24  ;;  %p106_p5 = scmp.lt.s32.totalorder %s100_s24, %s100_s24 }
   0xa   :  { %p107_p6 = por %p106_p5, %p105_p4 }
   0xc   :  { %p108_p7 = pnand %p107_p6, %p101_p3 }
   0xe   :  { %111 = shalt.err (!%p108_p7)
}
   0xf   :  { %s115_s25 = smov 128   ;;  %s116_s26 = smov 8  }
  0x10   :  { %21 = dma.hbm_to_vmem [thread:$0]  %s169_s0, 256, %s16_s16, [#allocation3], %s115_s25, %s115_s25, %s116_s26  }
  0x11   :  { %112 = dma.done.wait [#allocation3], 256  }
  0x12   :  { %113 = vsyncadd [#allocation3], 4294967040  ;;  %v37_v0 = vlaneseq  ;;  %v31_v3 = vld [vmem:[#allocation2] sm:$0xff]  ;;  %v33_v4 = vld [vmem:[%s170_s1] sm:$0x1]  ;;  %vm72_vm2 = vcmask 261120  }
  0x13   :  { %v34_v5 = vld [vmem:[%s171_s2] sm:$0x1]  ;;  %v32_v10 = vld [vmem:[#allocation2 + $0x8] sm:$0xff]  ;;  %vm79_vm3 = vcmask 7168  }
  0x14   :  { %v38_v1 = vshrl.u32 %v37_v0, 7  ;;  %v35_v6 = vld [vmem:[%s172_s3] sm:$0x1]  ;;  %v52_v8 = vsub.f32 %v34_v5, %v33_v4 }
  0x16   :  { %v39_v2 = vsub.s32 0, %v38_v1  ;;  %v53_v13 = vmul.f32 %v52_v8, %v35_v6 }
  0x18   :  { %v48_v7 = vrot.slane %v33_v4, %v39_v2  ;;  %v66_v9 = vrot.slane %v34_v5, %v39_v2  ;;  %v40_v11 = vrot.slane %v35_v6, %v39_v2  ;;  %v58_v15 = vrot.slane %v53_v13, %v39_v2 }
  0x1a   :  { %v50_v12 = vmul.f32 %v48_v7, %v31_v3  ;;  %v51_v14 = vmul.f32 %v48_v7, %v32_v10  ;;  %v68_v16 = vmul.f32 %v66_v9, %v31_v3  ;;  %v69_v17 = vmul.f32 %v66_v9, %v32_v10 }
  0x1b   :  { %vm42_vm0 = vcmp.lt.f32.partialorder %v31_v3, %v40_v11  ;;  %vm43_vm1 = vcmp.lt.f32.partialorder %v32_v10, %v40_v11 }
  0x1c   :  { %v60_v18 = vadd.f32 %v58_v15, %v50_v12  ;;  %v61_v19 = vadd.f32 %v58_v15, %v51_v14 }
  0x1e   :  { %v70_v20 = vsel %vm42_vm0, %v60_v18, %v68_v16  ;;  %v71_v21 = vsel %vm43_vm1, %v61_v19, %v69_v17 }
  0x1f   :  { %v73_v22 = vsel %vm72_vm2, %v70_v20, 0.0  ;;  %v76_v23 = vsel %vm72_vm2, %v71_v21, 0.0 }
  0x20   :  { %74 = vadd.xlane.f32.xlu0 %v73_v22 }
  0x24   :  { %77 = vadd.xlane.f32.xlu0 %v76_v23 }
  0xad   :  { %v75_v24 = vpop.xlane.xlu0 %74 }
  0xae   :  { %80 = vst.msk [vmem:[%s173_s4] sm:$0xff] %vm79_vm3, %v75_v24 }
  0xb1   :  { %v78_v25 = vpop.xlane.xlu0 %77 }
  0xb2   :  { %81 = vst.msk [vmem:[%s173_s4 + $0x8] sm:$0xff] %vm79_vm3, %v78_v25 }
  0xb3   :  { %86 = vsyncpa [#allocation3], 1 }

</bundles_post_ra>
